<compile_context>
chip_gen: v7x
topology: tpu7x:2x2x1
jax: 0.10.0
libtpu: 0.0.40
codegen_flags: <defaults>
</compile_context>

<pallas_src>
import functools

import jax
import jax.numpy as jnp
from jax.experimental import pallas as pl
from jax.experimental.pallas import tpu as pltpu


def _shuffle_kernel(x_ref, o_ref, *, channels, groups):
    # x_ref / o_ref: (1, C, S) VMEM tiles; S is the lane-dense flattened
    # spatial chunk.  The shuffle is a static permutation of the C sublane
    # rows: out channel c_out = j*g + i  <-  in channel c_in = i*(C//g) + j.
    cpg = channels // groups
    for c_out in range(channels):
        c_in = (c_out % groups) * cpg + (c_out // groups)
        o_ref[0, c_out, :] = x_ref[0, c_in, :]


def _pick_spatial_block(hw, channels, itemsize, budget_bytes=8 << 20):
    """Largest spatial chunk s (dividing hw, multiple of 128) with
    C * s * itemsize under the per-buffer budget.  Full hw if it fits."""
    if channels * hw * itemsize <= budget_bytes:
        return hw
    for d in range(2, min(hw, 4096) + 1):
        if hw % d:
            continue
        blk = hw // d
        if blk % 128 == 0 and channels * blk * itemsize <= budget_bytes:
            return blk
    # TODO(synk): no lane-dense divisor of H*W found; falling back to the full
    # spatial extent (may exceed the soft VMEM budget for extreme shapes).
    return hw


@functools.partial(jax.jit, static_argnames=("groups",))
def shuffle_block_forward(x, *, groups):
    """Equivalent of ShuffleBlock(groups).forward(x) for NCHW input."""
    N, C, H, W = x.shape
    if C % groups != 0:
        raise ValueError("channels must be divisible by groups")
    HW = H * W
    x2 = x.reshape(N, C, HW)  # free reshape: NCHW input is contiguous

    s_block = _pick_spatial_block(HW, C, x.dtype.itemsize)
    n_s = HW // s_block

    kernel = functools.partial(_shuffle_kernel, channels=C, groups=groups)

    out = pl.pallas_call(
        kernel,
        out_shape=jax.ShapeDtypeStruct((N, C, HW), x.dtype),
        grid_spec=pltpu.PrefetchScalarGridSpec(
            num_scalar_prefetch=0,
            grid=(N, n_s),
            in_specs=[pl.BlockSpec((1, C, s_block), lambda n, s: (n, 0, s))],
            out_specs=pl.BlockSpec((1, C, s_block), lambda n, s: (n, 0, s)),
        ),
        compiler_params=pltpu.CompilerParams(
            dimension_semantics=("parallel", "parallel"),
        ),
        cost_estimate=pl.CostEstimate(
            flops=0,
            transcendentals=0,
            bytes_accessed=2 * N * C * HW * x.dtype.itemsize,
        ),
    )(x2)

    return out.reshape(N, C, H, W)


def channel_shuffle_ref(x, g):
    """Pure-JAX reference of the PyTorch channel_shuffle."""
    n, c, h, w = x.shape
    return (
        x.reshape(n, g, c // g, h, w)
        .transpose(0, 2, 1, 3, 4)
        .reshape(n, c, h, w)
    )


if __name__ == "__main__":
    key = jax.random.PRNGKey(0)
    N, C, H, W = 2, 4, 16, 16
    groups = 2

    x = jax.random.normal(key, (N, C, H, W), dtype=jnp.float32)

    y = shuffle_block_forward(x, groups=groups)
    jax.block_until_ready(y)

    y_ref = channel_shuffle_ref(x, groups)
    assert y.shape == (N, C, H, W)
    assert jnp.array_equal(y, y_ref), "channel shuffle mismatch"

    print("KERNEL_OK")
</pallas_src>

<mosaic_0001>
module attributes {stable_mosaic.version = 11 : i64} {
  func.func @_shuffle_kernel(%arg0: i32, %arg1: i32, %arg2: memref<1x4x256xf32, #tpu.memory_space<vmem>>, %arg3: memref<1x4x256xf32, #tpu.memory_space<vmem>>) attributes {dimension_semantics = [#tpu.dimension_semantics<parallel>, #tpu.dimension_semantics<parallel>], iteration_bounds = array<i64: 2, 1>, scalar_prefetch = 0 : i64, scratch_operands = 0 : i64, tpu.core_type = #tpu.core_type<tc>, window_params = [{transform_indices = @transform_0, window_bounds = array<i64: 1, 4, 256>}, {transform_indices = @transform_1, window_bounds = array<i64: 1, 4, 256>}]} {
    %c0 = arith.constant 0 : index
    %c0_0 = arith.constant 0 : index
    %c0_1 = arith.constant 0 : index
    %0 = vector.load %arg2[%c0, %c0_0, %c0_1] : memref<1x4x256xf32, #tpu.memory_space<vmem>>, vector<1x1x256xf32>
    %1 = vector.shape_cast %0 : vector<1x1x256xf32> to vector<256xf32>
    %c0_2 = arith.constant 0 : index
    %c0_3 = arith.constant 0 : index
    %c0_4 = arith.constant 0 : index
    %2 = vector.load %arg3[%c0_2, %c0_3, %c0_4] : memref<1x4x256xf32, #tpu.memory_space<vmem>>, vector<1x1x256xf32>
    %3 = vector.shape_cast %2 : vector<1x1x256xf32> to vector<256xf32>
    %4 = vector.shape_cast %1 : vector<256xf32> to vector<1x1x256xf32>
    tpu.vector_store %arg3[%c0_2, %c0_3, %c0_4], %4 {strides = array<i32>} : memref<1x4x256xf32, #tpu.memory_space<vmem>>, vector<1x1x256xf32>,
    %c0_5 = arith.constant 0 : index
    %c2 = arith.constant 2 : index
    %c0_6 = arith.constant 0 : index
    %5 = vector.load %arg2[%c0_5, %c2, %c0_6] : memref<1x4x256xf32, #tpu.memory_space<vmem>>, vector<1x1x256xf32>
    %6 = vector.shape_cast %5 : vector<1x1x256xf32> to vector<256xf32>
    %c0_7 = arith.constant 0 : index
    %c1 = arith.constant 1 : index
    %c0_8 = arith.constant 0 : index
    %7 = vector.load %arg3[%c0_7, %c1, %c0_8] : memref<1x4x256xf32, #tpu.memory_space<vmem>>, vector<1x1x256xf32>
    %8 = vector.shape_cast %7 : vector<1x1x256xf32> to vector<256xf32>
    %9 = vector.shape_cast %6 : vector<256xf32> to vector<1x1x256xf32>
    tpu.vector_store %arg3[%c0_7, %c1, %c0_8], %9 {strides = array<i32>} : memref<1x4x256xf32, #tpu.memory_space<vmem>>, vector<1x1x256xf32>,
    %c0_9 = arith.constant 0 : index
    %c1_10 = arith.constant 1 : index
    %c0_11 = arith.constant 0 : index
    %10 = vector.load %arg2[%c0_9, %c1_10, %c0_11] : memref<1x4x256xf32, #tpu.memory_space<vmem>>, vector<1x1x256xf32>
    %11 = vector.shape_cast %10 : vector<1x1x256xf32> to vector<256xf32>
    %c0_12 = arith.constant 0 : index
    %c2_13 = arith.constant 2 : index
    %c0_14 = arith.constant 0 : index
    %12 = vector.load %arg3[%c0_12, %c2_13, %c0_14] : memref<1x4x256xf32, #tpu.memory_space<vmem>>, vector<1x1x256xf32>
    %13 = vector.shape_cast %12 : vector<1x1x256xf32> to vector<256xf32>
    %14 = vector.shape_cast %11 : vector<256xf32> to vector<1x1x256xf32>
    tpu.vector_store %arg3[%c0_12, %c2_13, %c0_14], %14 {strides = array<i32>} : memref<1x4x256xf32, #tpu.memory_space<vmem>>, vector<1x1x256xf32>,
    %c0_15 = arith.constant 0 : index
    %c3 = arith.constant 3 : index
    %c0_16 = arith.constant 0 : index
    %15 = vector.load %arg2[%c0_15, %c3, %c0_16] : memref<1x4x256xf32, #tpu.memory_space<vmem>>, vector<1x1x256xf32>
    %16 = vector.shape_cast %15 : vector<1x1x256xf32> to vector<256xf32>
    %c0_17 = arith.constant 0 : index
    %c3_18 = arith.constant 3 : index
    %c0_19 = arith.constant 0 : index
    %17 = vector.load %arg3[%c0_17, %c3_18, %c0_19] : memref<1x4x256xf32, #tpu.memory_space<vmem>>, vector<1x1x256xf32>
    %18 = vector.shape_cast %17 : vector<1x1x256xf32> to vector<256xf32>
    %19 = vector.shape_cast %16 : vector<256xf32> to vector<1x1x256xf32>
    tpu.vector_store %arg3[%c0_17, %c3_18, %c0_19], %19 {strides = array<i32>} : memref<1x4x256xf32, #tpu.memory_space<vmem>>, vector<1x1x256xf32>,
    return
  }
  func.func @transform_0(%arg0: i32, %arg1: i32) -> (i32, i32, i32) {
    %c0_i32 = arith.constant 0 : i32
    %c0_i32_0 = arith.constant 0 : i32
    return %arg0, %c0_i32, %arg1 : i32, i32, i32
  }
  func.func @transform_1(%arg0: i32, %arg1: i32) -> (i32, i32, i32) {
    %c0_i32 = arith.constant 0 : i32
    %c0_i32_0 = arith.constant 0 : i32
    return %arg0, %c0_i32, %arg1 : i32, i32, i32
  }
}

</mosaic_0001>

<bundles_post_ra>
// kernel: shuffle_block_forward.1
= control target key start
LH: loop header
LB: loop body
LE: loop exit
PB: predicated region body
PF: predicated region fallthrough
CT: control target
= control target key end

     0   :  { %s338_s6 = smov 0   ;;  %s340_s7 = smov 0   ;;  %s359_s0 = inlined_call_operand.vmem [shape: f32[2,4,256], index: 0, kind: input, shape index: {}]   ;;  %s360_s1 = inlined_call_operand.vmem [shape: f32[2,4,256], index: 1, kind: output, shape index: {}]  }
   0x1   :  { %s342_s8 = smov 0  }
   0x2 LB: > { %s23_s9 = sadd.s32 1, %s322_s7  ;;  %p265_p0 = scmp.ge.s32.totalorder %s326_s8, 1  ;;  %s326_s8 = sphi %s342_s8, %s11_s8   ;;  %s322_s7 = sphi %s340_s7, %s362_s7   ;;  %s318_s6 = sphi %s338_s6, %s361_s6  }
   0x3   : > { %p25_p1 = scmp.ge.s32.totalorder %s23_s9, 2  ;;  %p108_p2 = scmp.lt.s32.totalorder %s326_s8, 3 }
   0x5   : > { %s364_s9 = smov (%p25_p1, %s23_s9), 0  ;;  %p109_p3 = pnand %p265_p0, %p108_p2 }
   0x6   : > { %p137_p4 = scmp.lt.s32.totalorder (!%p109_p3), %s318_s6, 1  ;;  %v157_v0 = vlaneseq (!%p109_p3) }
   0x7   : > { %112 = sbr.rel (%p109_p3) target bundleno = 21 (0x15), region = 24 }
   0x8   : > { %vm159_vm0 = vcmp.lt.s32.totalorder (!%p109_p3), %v157_v0, 256 }
   0xe   : > { %s366_s6 = smov (!%p137_p4, %s318_s6), 1 }
   0xf   : > { %s278_s10 = sshll.u32 %s366_s6, 3 }
  0x10   : > { %s144_s13 = scalar_lea.vmem %s359_s0, %s278_s10  ;;  %s154_s16 = scalar_lea.vmem %s360_s1, %s278_s10 }
  0x11   : > { %v156_v1 = vld [vmem:[%s144_s13] ss:$4 sm:$0x3]  ;;  %v270_v2 = vld [vmem:[%s144_s13 + $0x2] ss:$4 sm:$0x3] }
  0x12   : > { %161 = vst.msk [vmem:[%s154_s16] ss:$4 sm:$0x3] %vm159_vm0, %v156_v1  ;;  %271 = vst.msk [vmem:[%s154_s16 + $0x1] ss:$4 sm:$0x3] %vm159_vm0, %v270_v2 }
  0x13   : > { %v272_v3 = vld [vmem:[%s144_s13 + $0x1] ss:$4 sm:$0x3]  ;;  %v274_v4 = vld [vmem:[%s144_s13 + $0x3] ss:$4 sm:$0x3] }
  0x14   : > { %273 = vst.msk [vmem:[%s154_s16 + $0x2] ss:$4 sm:$0x3] %vm159_vm0, %v272_v3  ;;  %275 = vst.msk [vmem:[%s154_s16 + $0x3] ss:$4 sm:$0x3] %vm159_vm0, %v274_v4 }
  0x15 PF: > { %s11_s8 = sadd.s32 1, %s326_s8   ;;  %s361_s6 = smov %s322_s7 }
  0x16   : > { %p8_p5 = scmp.ge.s32.totalorder %s11_s8, 4   ;;  %s362_s7 = smov %s364_s9 }
  0x18   :  { %10 = sbr.rel (!%p8_p5) target bundleno = 2 (0x2), region = 60 }

</bundles_post_ra>
